<compile_context>
chip_gen: v6e
topology: v6e:2x2x1
jax: 0.10.0
libtpu: 0.0.40
codegen_flags: <defaults>
</compile_context>

<pallas_src>
import jax
import jax.numpy as jnp
from jax.experimental import pallas as pl
from jax.experimental.pallas import tpu as pltpu


def _norm_mul_kernel(s_ref, x_ref, o_ref):
    # s_ref : VMEM, (row_blk, 1)       -- f32 per-row reciprocal of rggb_max
    # x_ref : VMEM, (row_blk, col_blk) -- flattened image rows
    # o_ref : VMEM, (row_blk, col_blk)
    x = x_ref[...].astype(jnp.float32)
    o_ref[...] = (x * s_ref[...]).astype(o_ref.dtype)


def _sublane_multiple(dtype) -> int:
    # Native sublane tile: 8 for 32-bit, 16 for 16-bit, 32 for 8-bit dtypes.
    itemsize = jnp.dtype(dtype).itemsize
    return 8 * max(1, 4 // itemsize)


def preproc_norm_max(x: jax.Array, rggb_max: jax.Array,
                     *, target_block_bytes: int = 8 * 1024 * 1024,
                     small_input_bytes: int = 1 << 20,
                     force_pallas: bool = False) -> jax.Array:
    """x: (N, C, H, W); rggb_max: (C,). Returns x / rggb_max[None, :, None, None]."""
    N, C, H, W = x.shape
    assert rggb_max.shape == (C,)

    inv = 1.0 / rggb_max.astype(jnp.float32)          # f32 reciprocals
    itemsize = jnp.dtype(x.dtype).itemsize

    # Small-input fallback: pallas_call/grid setup overhead (multi-us) dwarfs
    # a sub-us elementwise op; plain fused XLA is strictly faster there.
    if (x.size * itemsize < small_input_bytes) and not force_pallas:
        return (x.astype(jnp.float32) * inv.reshape(1, C, 1, 1)).astype(x.dtype)

    sub = _sublane_multiple(x.dtype)

    # 2D lane-dense view. If N*C can't fill the sublane tile, fold part of H
    # into the row axis so vregs are fully occupied.
    R = N * C
    fold = 1
    if R < sub and H > 1:
        divisors = [f for f in range(1, H + 1) if H % f == 0]
        exact = [f for f in divisors if (R * f) % sub == 0]
        big = [f for f in divisors if R * f >= sub]
        fold = exact[0] if exact else (big[0] if big else H)
    rows = R * fold
    cols = (H // fold) * W
    x2 = x.reshape(rows, cols)

    # Row tile: native sublane tile; ragged tail blocks are clipped by Pallas
    # (never fall back to a huge rows-sized tile).
    row_blk = sub if rows >= sub else rows
    row_steps = pl.cdiv(rows, row_blk)

    # Column tile: full extent for small images, otherwise a lane-dense
    # (multiple of 128) tile sized so one buffer is ~target_block_bytes.
    max_cols = max(128, (target_block_bytes // (row_blk * itemsize)) // 128 * 128)
    col_blk = cols if cols <= max_cols else max_cols
    col_steps = pl.cdiv(cols, col_blk)

    # v7x megacore: if the row grid has a single step, keep >=4 column steps
    # so both TensorCores get work (no-op on single-core v5e/v6e).
    if row_steps == 1 and col_steps < 4 and cols >= 4 * 128:
        col_blk = max(128, (cols // 4) // 128 * 128)
        col_steps = pl.cdiv(cols, col_blk)

    # Per-row reciprocal block. Row r -> channel (r // fold) % C.
    period = C * fold
    if row_blk % period == 0:
        # Pattern repeats inside every row block -> one constant, VMEM-resident
        # (row_blk, 1) block; no per-step scale DMA.
        scale = jnp.tile(jnp.repeat(inv, fold), row_blk // period).reshape(row_blk, 1)
        scale_spec = pl.BlockSpec((row_blk, 1), lambda i, j: (0, 0))
    else:
        scale = jnp.tile(jnp.repeat(inv, fold), N).reshape(rows, 1)
        scale_spec = pl.BlockSpec((row_blk, 1), lambda i, j: (i, 0))

    out2 = pl.pallas_call(
        _norm_mul_kernel,
        out_shape=jax.ShapeDtypeStruct((rows, cols), x.dtype),
        grid=(row_steps, col_steps),
        in_specs=[
            scale_spec,
            pl.BlockSpec((row_blk, col_blk), lambda i, j: (i, j)),
        ],
        out_specs=pl.BlockSpec((row_blk, col_blk), lambda i, j: (i, j)),
        compiler_params=pltpu.CompilerParams(
            dimension_semantics=("parallel", "parallel"),
            # ~2x8 MiB in + 2x8 MiB out + scale; <=48 MiB is safe on v7x's
            # 64 MiB VMEM and has plenty of headroom on v5e/v6e (128 MiB).
            vmem_limit_bytes=48 * 1024 * 1024,
        ),
    )(scale, x2)

    return out2.reshape(N, C, H, W)


if __name__ == "__main__":
    # Small shapes consistent with an RGGB raw preprocessing layer.
    N, C, H, W = 2, 4, 16, 16

    key = jax.random.PRNGKey(0)
    x = jax.random.uniform(key, (N, C, H, W), dtype=jnp.float32) * 1023.0

    # Deterministic "parameters" (the module's preproc_params['rggb_max']).
    rggb_max = jnp.array([1023.0, 959.0, 959.0, 895.0], dtype=jnp.float32)

    # Force the Pallas path (the shapes here are below the small-input
    # fallback threshold) so the kernel itself compiles and runs.
    out = preproc_norm_max(x, rggb_max, force_pallas=True)
    out = jax.block_until_ready(out)

    # Reference (pure JAX), matching x / rggb_max.reshape(1, C, 1, 1).
    # Multiply-by-f32-reciprocal differs from exact divide by ~1-2 ulp.
    ref = x / rggb_max.reshape(1, C, 1, 1)
    assert out.shape == x.shape and out.dtype == x.dtype
    assert jnp.allclose(out, ref, rtol=1e-6, atol=1e-6)

    print("KERNEL_OK")
</pallas_src>

<mosaic_0001>
module attributes {stable_mosaic.version = 11 : i64} {
  func.func @_norm_mul_kernel(%arg0: i32, %arg1: i32, %arg2: memref<8x1xf32, #tpu.memory_space<vmem>>, %arg3: memref<8x256xf32, #tpu.memory_space<vmem>>, %arg4: memref<8x256xf32, #tpu.memory_space<vmem>>) attributes {dimension_semantics = [#tpu.dimension_semantics<parallel>, #tpu.dimension_semantics<parallel>], iteration_bounds = array<i64: 1, 1>, scalar_prefetch = 0 : i64, scratch_operands = 0 : i64, tpu.core_type = #tpu.core_type<tc>, window_params = [{pipeline_mode = #tpu.pipeline_mode<synchronous>, transform_indices = @transform_0, window_bounds = array<i64: 8, 1>}, {transform_indices = @transform_1, window_bounds = array<i64: 8, 256>}, {transform_indices = @transform_2, window_bounds = array<i64: 8, 256>}]} {
    %c0 = arith.constant 0 : index
    %c0_0 = arith.constant 0 : index
    %0 = vector.load %arg3[%c0, %c0_0] : memref<8x256xf32, #tpu.memory_space<vmem>>, vector<8x256xf32>
    %c0_1 = arith.constant 0 : index
    %c0_2 = arith.constant 0 : index
    %1 = vector.load %arg2[%c0_1, %c0_2] : memref<8x1xf32, #tpu.memory_space<vmem>>, vector<8x1xf32>
    %2 = vector.broadcast %1 : vector<8x1xf32> to vector<8x256xf32>
    %3 = arith.mulf %0, %2 : vector<8x256xf32>
    %c0_3 = arith.constant 0 : index
    %c0_4 = arith.constant 0 : index
    %4 = vector.load %arg4[%c0_3, %c0_4] : memref<8x256xf32, #tpu.memory_space<vmem>>, vector<8x256xf32>
    tpu.vector_store %arg4[%c0_3, %c0_4], %3 {strides = array<i32>} : memref<8x256xf32, #tpu.memory_space<vmem>>, vector<8x256xf32>,
    return
  }
  func.func @transform_0(%arg0: i32, %arg1: i32) -> (i32, i32) {
    %c0_i32 = arith.constant 0 : i32
    %c0_i32_0 = arith.constant 0 : i32
    %c0_i32_1 = arith.constant 0 : i32
    return %c0_i32, %c0_i32_0 : i32, i32
  }
  func.func @transform_1(%arg0: i32, %arg1: i32) -> (i32, i32) {
    %c0_i32 = arith.constant 0 : i32
    return %arg0, %arg1 : i32, i32
  }
  func.func @transform_2(%arg0: i32, %arg1: i32) -> (i32, i32) {
    %c0_i32 = arith.constant 0 : i32
    return %arg0, %arg1 : i32, i32
  }
}

</mosaic_0001>

<bundles_post_ra>
// kernel: tpu_custom_call.1
= control target key start
LH: loop header
LB: loop body
LE: loop exit
PB: predicated region body
PF: predicated region fallthrough
CT: control target
= control target key end

     0   :  { %7 = vsyncpa [#allocation3], 0  ;;  %s126_s0 = inlined_call_operand.vmem [shape: f32[8,1], index: 0, kind: input, shape index: {}]   ;;  %s127_s1 = inlined_call_operand.hbm [shape: f32[8,256], index: 1, kind: input, shape index: {}]   ;;  %s128_s2 = inlined_call_operand.hbm [shape: f32[8,256], index: 2, kind: output, shape index: {}]  }
   0x1   :  { %8 = vsyncpa [#allocation4], 0  ;;  %s99_s9 = smov [#allocation2]  }
   0x2   :  { %s17_s10 = sshll.u32 %s99_s9, 4  ;;  %s18_s10 = int_to_ptr.vmem [resolvable:$true] %s17_s10 }
   0x3   :  { %s63_s11 = scalar_lea.vmem %s18_s10, 256  ;;  %p68_p1 = scmp.lt.s32.totalorder %s18_s10, %s18_s10 }
   0x4   :  { %p64_p0 = scmp.ne.s32.totalorder %s18_s10, %s63_s11  ;;  %p69_p2 = scmp.lt.s32.totalorder %s63_s11, %s63_s11 }
   0x6   :  { %p70_p3 = por %p69_p2, %p68_p1 }
   0x8   :  { %p71_p4 = pnand %p70_p3, %p64_p0 }
   0xa   :  { %74 = shalt.err (!%p71_p4)
}
   0xb   :  { %20 = dma.hbm_to_vmem [thread:$0]  %s127_s1, 256, %s18_s10, [#allocation3]  }
   0xc   :  { %95 = dma.done.wait [#allocation3], 256  }
   0xd   :  { %96 = vsyncadd [#allocation3], 4294967040  ;;  %v100_v0 = vmov 0   ;;  %v26_v1 = vld [vmem:[%s126_s0] sm:$0xff]  ;;  %v25_v3 = vld [vmem:[#allocation2 + $0x8] sm:$0xff]  ;;  %s101_s16 = smov [#allocation5]  }
   0xe   :  { %54 = vset.pattern.permute.xlu0 %v100_v0  ;;  %v24_v2 = vld [vmem:[#allocation2] sm:$0xff]  ;;  %s42_s17 = sshll.u32 %s101_s16, 4  ;;  %s43_s17 = int_to_ptr.vmem [resolvable:$true] %s42_s17 }
   0xf   :  { %29 = vperm.xlu0 %54, %v26_v1   ;;  %s75_s1 = scalar_lea.vmem %s43_s17, 256  ;;  %p80_p6 = scmp.lt.s32.totalorder %s43_s17, %s43_s17 }
  0x10   :  { %p76_p5 = scmp.ne.s32.totalorder %s43_s17, %s75_s1  ;;  %p81_p7 = scmp.lt.s32.totalorder %s75_s1, %s75_s1 }
  0x12   :  { %p82_p8 = por %p81_p7, %p80_p6 }
  0x14   :  { %p83_p9 = pnand %p82_p8, %p76_p5 }
  0x8a   :  { %v30_v4 = vpop.permute.xlu0 %29 }
  0x8b   :  { %v32_v5 = vmul.f32 %v30_v4, %v24_v2  ;;  %v33_v6 = vmul.f32 %v30_v4, %v25_v3 }
  0x8d   :  { %34 = vst [vmem:[#allocation5] sm:$0xff] %v32_v5  ;;  %35 = vst [vmem:[#allocation5 + $0x8] sm:$0xff] %v33_v6 }
  0x8e   :  { %86 = shalt.err (!%p83_p9)
}
  0x8f   :  { %45 = dma.vmem_to_hbm [thread:$0]  %s43_s17, 256, %s128_s2, [#allocation4]  }
  0x90   :  { %97 = dma.done.wait [#allocation4], 256  }
  0x91   :  { %98 = vsyncadd [#allocation4], 4294967040 }
  0x92   :  { %49 = vsyncpa [#allocation3], 1 }
  0x93   :  { %50 = vsyncpa [#allocation4], 1 }

</bundles_post_ra>
